<compile_context>
chip_gen: v5e
topology: v5e:2x2
jax: 0.10.0
libtpu: 0.0.40
codegen_flags: <defaults>
</compile_context>

<pallas_src>
import jax
import jax.numpy as jnp
from jax.experimental import pallas as pl
from jax.experimental.pallas import tpu as pltpu

TENSOR_SHAPE = (8, 8, 12, 8, 8)   # from the module: tensor_shape = [8,8,12,8,8]
TT_RANK = 5                       # tensor_rank = 5
HIDDEN = 8 * 8 * 12               # 768  (ALBERT hidden_size)
ADAPTER = 8 * 8                   # 64   (adapter_size)
TM_ALIGN = 16                     # covers f32 (8,128) and bf16 (16,128) tiling


def _round_up(x, m):
    return (x + m - 1) // m * m


def _cdiv(a, b):
    return (a + b - 1) // b


def _gelu_tanh(x):
    # TODO(synk): HF ACT2FN["gelu"] is erf-based; tanh approximation used here
    # (matches "gelu_new") because tanh lowers cleanly on the TPU EUP.
    c = jnp.float32(0.7978845608028654)  # sqrt(2/pi)
    return 0.5 * x * (1.0 + jnp.tanh(c * (x + 0.044715 * x * x * x)))


def _hw_profile(act_dtype):
    """(row-tile target, min #tiles for megacore, VMEM cap) per TPU generation."""
    kind = ""
    try:
        kind = jax.devices()[0].device_kind.lower()
    except Exception:
        pass
    bf16_act = jnp.dtype(act_dtype).itemsize == 2
    if "v7" in kind:                        # 2 TCs/chip, 64 MiB VMEM/TC, 3.2 TB/s
        return (2048 if bf16_act else 1024), 2, 40 << 20
    if "v6" in kind:                        # 1 TC, 128 MiB VMEM
        return 1024, 1, 48 << 20
    return 512, 1, 48 << 20                 # v5e and anything unrecognized


def adapter_kernel(x_ref, wd_ref, bd_ref, wu_ref, bu_ref, o_ref):
    # bf16 view feeds the MXU; f32 accumulation; the f32 copy of x only lives
    # for the final residual store (keeps VMEM/vreg pressure low).
    x_bf = x_ref[...].astype(jnp.bfloat16)                              # (tm, H)
    down = jnp.dot(x_bf, wd_ref[...],
                   preferred_element_type=jnp.float32)                  # (tm, A)
    down = down + bd_ref[...]
    act = _gelu_tanh(down)
    up = jnp.dot(act.astype(jnp.bfloat16), wu_ref[...],
                 preferred_element_type=jnp.float32)                    # (tm, H)
    up = up + bu_ref[...]
    o_ref[...] = (x_ref[...].astype(jnp.float32) + up).astype(o_ref.dtype)


def prepare_adapter_params(w_down, b_down, w_up, b_up):
    """Cast weights to bf16 and biases to f32 once (call outside the hot loop)."""
    return (w_down.astype(jnp.bfloat16),
            b_down.astype(jnp.float32).reshape(1, -1),
            w_up.astype(jnp.bfloat16),
            b_up.astype(jnp.float32).reshape(1, -1))


def albert_adapter_tensor(hidden_states, w_down, b_down, w_up, b_up,
                          *, tm=None, donate_input=False):
    """out = x + gelu(x @ W_down + b_down) @ W_up + b_up  (token-wise residual)."""
    B, S, H = hidden_states.shape
    A = w_down.shape[1]
    M = B * S
    x2d = hidden_states.reshape(M, H)
    act_bytes = jnp.dtype(hidden_states.dtype).itemsize

    target, min_tiles, vmem_cap = _hw_profile(hidden_states.dtype)

    # --- tile selection: balanced, 16-aligned row tiles; NO padding of M -----
    if tm is None:
        n_tiles = _cdiv(M, target)
        if M >= min_tiles * TM_ALIGN:
            n_tiles = max(n_tiles, min_tiles)   # keep both v7x TCs busy
        tm = _round_up(_cdiv(M, n_tiles), TM_ALIGN)
    else:
        tm = _round_up(max(int(tm), TM_ALIGN), TM_ALIGN)
    if tm >= M:
        tm = M                                  # single full-extent block
    n_tiles = _cdiv(M, tm)                      # ragged last block is masked

    # --- parameters: bf16 weights for the MXU, f32 biases (cast only if raw) -
    wd = w_down if w_down.dtype == jnp.bfloat16 else w_down.astype(jnp.bfloat16)
    wu = w_up if w_up.dtype == jnp.bfloat16 else w_up.astype(jnp.bfloat16)
    bd = b_down.astype(jnp.float32).reshape(1, A)
    bu = b_up.astype(jnp.float32).reshape(1, H)

    # --- VMEM budget from the real working set, generation-aware cap ---------
    tile_bytes = tm * H * act_bytes                 # one x (or out) tile
    w_bytes = 2 * H * A * 2 + (A + H) * 4           # bf16 weights + f32 biases
    temp_bytes = 3 * tm * H * 4 + 2 * tm * A * 4    # f32 up/residual/gelu temps
    vmem_bytes = 4 * tile_bytes + 2 * w_bytes + temp_bytes + (4 << 20)
    vmem_bytes = int(min(max(vmem_bytes, 16 << 20), vmem_cap))

    cost = pl.CostEstimate(
        flops=4 * M * H * A,                        # two MxHxA-sized matmuls
        transcendentals=M * A,                      # tanh in gelu
        bytes_accessed=2 * M * H * act_bytes + 2 * 2 * H * A + 4 * (A + H),
    )

    extra_kwargs = {}
    if donate_input:
        # Only safe/useful when the caller's activation buffer is truly
        # donatable; otherwise XLA inserts a defensive copy (perf, not corr.).
        extra_kwargs["input_output_aliases"] = {0: 0}

    out2d = pl.pallas_call(
        adapter_kernel,
        out_shape=jax.ShapeDtypeStruct((M, H), hidden_states.dtype),
        grid_spec=pltpu.PrefetchScalarGridSpec(
            num_scalar_prefetch=0,
            grid=(n_tiles,),
            in_specs=[
                pl.BlockSpec((tm, H), lambda i: (i, 0)),   # x tile (pipelined)
                pl.BlockSpec((H, A), lambda i: (0, 0)),    # W_down (grid-invariant)
                pl.BlockSpec((1, A), lambda i: (0, 0)),    # b_down
                pl.BlockSpec((A, H), lambda i: (0, 0)),    # W_up (grid-invariant)
                pl.BlockSpec((1, H), lambda i: (0, 0)),    # b_up
            ],
            out_specs=pl.BlockSpec((tm, H), lambda i: (i, 0)),
        ),
        compiler_params=pltpu.CompilerParams(
            dimension_semantics=("parallel",),   # row tiles split across v7x TCs
            vmem_limit_bytes=vmem_bytes,
        ),
        cost_estimate=cost,
        **extra_kwargs,
    )(x2d, wd, bd, wu, bu)
    return out2d.reshape(B, S, H)


def tt_full_matrix(key, in_features, out_features, scale=0.3):
    """Materialize a TT-decomposed weight (cores over TENSOR_SHAPE, rank TT_RANK)
    into a dense (in_features, out_features) matrix."""
    dims = TENSOR_SHAPE
    ranks = (1,) + (TT_RANK,) * (len(dims) - 1) + (1,)
    cores = []
    for i, n in enumerate(dims):
        key, sub = jax.random.split(key)
        cores.append(jax.random.normal(sub, (ranks[i], n, ranks[i + 1]),
                                       dtype=jnp.float32) * scale)
    full = cores[0]
    for c in cores[1:]:
        full = jnp.tensordot(full, c, axes=[[full.ndim - 1], [0]])
    full = full.reshape(dims)                       # (8,8,12,8,8)
    assert in_features * out_features == full.size
    return full.reshape(in_features, out_features)


def reference(hidden_states, w_down, b_down, w_up, b_up):
    """Plain-JAX reference using the same mixed-precision recipe as the kernel."""
    x = hidden_states.astype(jnp.float32)
    wd = w_down.astype(jnp.bfloat16)
    wu = w_up.astype(jnp.bfloat16)
    down = jnp.einsum("bsh,ha->bsa", x.astype(jnp.bfloat16), wd,
                      preferred_element_type=jnp.float32) + b_down.reshape(-1)
    act = _gelu_tanh(down)
    up = jnp.einsum("bsa,ah->bsh", act.astype(jnp.bfloat16), wu,
                    preferred_element_type=jnp.float32) + b_up.reshape(-1)
    return x + up


if __name__ == "__main__":
    key = jax.random.PRNGKey(0)
    k_x, k_wd, k_wu, k_bd, k_bu, k_x2 = jax.random.split(key, 6)

    w_down = tt_full_matrix(k_wd, HIDDEN, ADAPTER)            # (768, 64)
    w_up = tt_full_matrix(k_wu, ADAPTER, HIDDEN)              # (64, 768)
    b_down = jax.random.normal(k_bd, (1, ADAPTER), dtype=jnp.float32) * 0.02
    b_up = jax.random.normal(k_bu, (1, HIDDEN), dtype=jnp.float32) * 0.02

    # Pre-cast params once (bf16 weights, f32 biases) -- done outside the jit.
    wd_bf, bd_f32, wu_bf, bu_f32 = prepare_adapter_params(w_down, b_down, w_up, b_up)

    fn = jax.jit(albert_adapter_tensor)

    # --- test 1: f32 activations, M = 16 (single full-extent block) ----------
    B, S = 2, 8
    x_f32 = jax.random.normal(k_x, (B, S, HIDDEN), dtype=jnp.float32)
    out = jax.block_until_ready(fn(x_f32, wd_bf, bd_f32, wu_bf, bu_f32))
    ref = reference(x_f32, w_down, b_down, w_up, b_up)
    assert out.shape == (B, S, HIDDEN) and out.dtype == x_f32.dtype
    assert jnp.allclose(out, ref, atol=2e-2, rtol=2e-2), "f32 mismatch vs reference"

    # --- test 2: bf16 activations, ragged M = 3*37 = 111 (masked last block) -
    B2, S2 = 3, 37
    x_bf16 = jax.random.normal(
        k_x2, (B2, S2, HIDDEN), dtype=jnp.float32).astype(jnp.bfloat16)
    out2 = jax.block_until_ready(fn(x_bf16, wd_bf, bd_f32, wu_bf, bu_f32))
    ref2 = reference(x_bf16, w_down, b_down, w_up, b_up)
    assert out2.shape == (B2, S2, HIDDEN) and out2.dtype == jnp.bfloat16
    assert jnp.allclose(out2.astype(jnp.float32), ref2, atol=6e-2, rtol=6e-2), \
        "bf16 mismatch vs reference"

    print("KERNEL_OK")
</pallas_src>

<mosaic_0001>
module attributes {stable_mosaic.version = 11 : i64} {
  func.func @adapter_kernel(%arg0: i32, %arg1: memref<16x768xf32, #tpu.memory_space<vmem>>, %arg2: memref<768x64xbf16, #tpu.memory_space<vmem>>, %arg3: memref<1x64xf32, #tpu.memory_space<vmem>>, %arg4: memref<64x768xbf16, #tpu.memory_space<vmem>>, %arg5: memref<1x768xf32, #tpu.memory_space<vmem>>, %arg6: memref<16x768xf32, #tpu.memory_space<vmem>>) attributes {dimension_semantics = [#tpu.dimension_semantics<parallel>], iteration_bounds = array<i64: 1>, scalar_prefetch = 0 : i64, scratch_operands = 0 : i64, tpu.core_type = #tpu.core_type<tc>, window_params = [{transform_indices = @transform_0, window_bounds = array<i64: 16, 768>}, {pipeline_mode = #tpu.pipeline_mode<synchronous>, transform_indices = @transform_1, window_bounds = array<i64: 768, 64>}, {pipeline_mode = #tpu.pipeline_mode<synchronous>, transform_indices = @transform_2, window_bounds = array<i64: 1, 64>}, {pipeline_mode = #tpu.pipeline_mode<synchronous>, transform_indices = @transform_3, window_bounds = array<i64: 64, 768>}, {pipeline_mode = #tpu.pipeline_mode<synchronous>, transform_indices = @transform_4, window_bounds = array<i64: 1, 768>}, {transform_indices = @transform_5, window_bounds = array<i64: 16, 768>}]} {
    %c0 = arith.constant 0 : index
    %c0_0 = arith.constant 0 : index
    %0 = vector.load %arg1[%c0, %c0_0] : memref<16x768xf32, #tpu.memory_space<vmem>>, vector<16x768xf32>
    %1 = arith.truncf %0 : vector<16x768xf32> to vector<16x768xbf16>
    %c0_1 = arith.constant 0 : index
    %c0_2 = arith.constant 0 : index
    %2 = vector.load %arg2[%c0_1, %c0_2] : memref<768x64xbf16, #tpu.memory_space<vmem>>, vector<768x64xbf16>
    %cst = arith.constant dense<0.000000e+00> : vector<16x64xf32>
    %3 = tpu.matmul %1, %2, %cst {dimension_numbers = #tpu.dot_dimension_numbers<[1], [0], [0], [1], [0, 0, 1, 1], [], []>} : vector<16x768xbf16>, vector<768x64xbf16>, vector<16x64xf32> -> vector<16x64xf32>
    %c0_3 = arith.constant 0 : index
    %c0_4 = arith.constant 0 : index
    %4 = vector.load %arg3[%c0_3, %c0_4] : memref<1x64xf32, #tpu.memory_space<vmem>>, vector<1x64xf32>
    %5 = vector.broadcast %4 : vector<1x64xf32> to vector<16x64xf32>
    %6 = arith.addf %3, %5 : vector<16x64xf32>
    %cst_5 = arith.constant 5.000000e-01 : f32
    %7 = vector.broadcast %cst_5 : f32 to vector<16x64xf32>
    %8 = arith.mulf %7, %6 : vector<16x64xf32>
    %cst_6 = arith.constant 4.471500e-02 : f32
    %9 = vector.broadcast %cst_6 : f32 to vector<16x64xf32>
    %10 = arith.mulf %9, %6 : vector<16x64xf32>
    %11 = arith.mulf %10, %6 : vector<16x64xf32>
    %12 = arith.mulf %11, %6 : vector<16x64xf32>
    %13 = arith.addf %6, %12 : vector<16x64xf32>
    %cst_7 = arith.constant 0.797884583 : f32
    %14 = vector.broadcast %cst_7 : f32 to vector<16x64xf32>
    %15 = arith.mulf %14, %13 : vector<16x64xf32>
    %16 = math.tanh %15 : vector<16x64xf32>
    %cst_8 = arith.constant 1.000000e+00 : f32
    %17 = vector.broadcast %cst_8 : f32 to vector<16x64xf32>
    %18 = arith.addf %17, %16 : vector<16x64xf32>
    %19 = arith.mulf %8, %18 : vector<16x64xf32>
    %20 = arith.truncf %19 : vector<16x64xf32> to vector<16x64xbf16>
    %c0_9 = arith.constant 0 : index
    %c0_10 = arith.constant 0 : index
    %21 = vector.load %arg4[%c0_9, %c0_10] : memref<64x768xbf16, #tpu.memory_space<vmem>>, vector<64x768xbf16>
    %cst_11 = arith.constant dense<0.000000e+00> : vector<16x768xf32>
    %22 = tpu.matmul %20, %21, %cst_11 {dimension_numbers = #tpu.dot_dimension_numbers<[1], [0], [0], [1], [0, 0, 1, 1], [], []>} : vector<16x64xbf16>, vector<64x768xbf16>, vector<16x768xf32> -> vector<16x768xf32>
    %c0_12 = arith.constant 0 : index
    %c0_13 = arith.constant 0 : index
    %23 = vector.load %arg5[%c0_12, %c0_13] : memref<1x768xf32, #tpu.memory_space<vmem>>, vector<1x768xf32>
    %24 = vector.broadcast %23 : vector<1x768xf32> to vector<16x768xf32>
    %25 = arith.addf %22, %24 : vector<16x768xf32>
    %c0_14 = arith.constant 0 : index
    %c0_15 = arith.constant 0 : index
    %26 = vector.load %arg1[%c0_14, %c0_15] : memref<16x768xf32, #tpu.memory_space<vmem>>, vector<16x768xf32>
    %27 = arith.addf %26, %25 : vector<16x768xf32>
    %c0_16 = arith.constant 0 : index
    %c0_17 = arith.constant 0 : index
    %28 = vector.load %arg6[%c0_16, %c0_17] : memref<16x768xf32, #tpu.memory_space<vmem>>, vector<16x768xf32>
    tpu.vector_store %arg6[%c0_16, %c0_17], %27 {strides = array<i32>} : memref<16x768xf32, #tpu.memory_space<vmem>>, vector<16x768xf32>,
    return
  }
  func.func @transform_0(%arg0: i32) -> (i32, i32) {
    %c0_i32 = arith.constant 0 : i32
    %c0_i32_0 = arith.constant 0 : i32
    return %arg0, %c0_i32 : i32, i32
  }
  func.func @transform_1(%arg0: i32) -> (i32, i32) {
    %c0_i32 = arith.constant 0 : i32
    %c0_i32_0 = arith.constant 0 : i32
    %c0_i32_1 = arith.constant 0 : i32
    return %c0_i32, %c0_i32_0 : i32, i32
  }
  func.func @transform_2(%arg0: i32) -> (i32, i32) {
    %c0_i32 = arith.constant 0 : i32
    %c0_i32_0 = arith.constant 0 : i32
    %c0_i32_1 = arith.constant 0 : i32
    return %c0_i32, %c0_i32_0 : i32, i32
  }
  func.func @transform_3(%arg0: i32) -> (i32, i32) {
    %c0_i32 = arith.constant 0 : i32
    %c0_i32_0 = arith.constant 0 : i32
    %c0_i32_1 = arith.constant 0 : i32
    return %c0_i32, %c0_i32_0 : i32, i32
  }
  func.func @transform_4(%arg0: i32) -> (i32, i32) {
    %c0_i32 = arith.constant 0 : i32
    %c0_i32_0 = arith.constant 0 : i32
    %c0_i32_1 = arith.constant 0 : i32
    return %c0_i32, %c0_i32_0 : i32, i32
  }
  func.func @transform_5(%arg0: i32) -> (i32, i32) {
    %c0_i32 = arith.constant 0 : i32
    %c0_i32_0 = arith.constant 0 : i32
    return %arg0, %c0_i32 : i32, i32
  }
}

</mosaic_0001>

<bundles_post_ra>
// kernel: albert_adapter_tensor.1
= control target key start
LH: loop header
LB: loop body
LE: loop exit
PB: predicated region body
PF: predicated region fallthrough
CT: control target
= control target key end

     0   :  { %s1633_s0 = inlined_call_operand.vmem [shape: f32[16,768], index: 0, kind: input, shape index: {}]   ;;  %s1634_s1 = inlined_call_operand.vmem [shape: bf16[768,64], index: 1, kind: input, shape index: {}]   ;;  %s1635_s2 = inlined_call_operand.vmem [shape: f32[1,64], index: 2, kind: input, shape index: {}]   ;;  %s1636_s3 = inlined_call_operand.vmem [shape: bf16[64,768], index: 3, kind: input, shape index: {}]   ;;  %s1637_s4 = inlined_call_operand.vmem [shape: f32[1,768], index: 4, kind: input, shape index: {}]   ;;  %s1638_s5 = inlined_call_operand.hbm [shape: f32[16,768], index: 5, kind: output, shape index: {}]  }
   0x1   :  { %v1120_v0 = vld [vmem:[%s1634_s1 + $0x38] sm:$0xff]  ;;  %v1119_v4 = vld [vmem:[%s1634_s1 + $0x30] sm:$0xff]  ;;  %v1118_v8 = vld [vmem:[%s1634_s1 + $0x28] sm:$0xff] }
   0x2   :  { %v1128_v1 = vld [vmem:[%s1634_s1 + $0x78] sm:$0xff]  ;;  %428 = vmatpush.bf16.msra.mxu0 %v1120_v0  ;;  %v1127_v5 = vld [vmem:[%s1634_s1 + $0x70] sm:$0xff]  ;;  %v1126_v9 = vld [vmem:[%s1634_s1 + $0x68] sm:$0xff] }
   0x3   :  { %v1136_v2 = vld [vmem:[%s1634_s1 + $0xb8] sm:$0xff]  ;;  %442 = vmatpush.bf16.msra.mxu1 %v1128_v1  ;;  %v1135_v6 = vld [vmem:[%s1634_s1 + $0xb0] sm:$0xff]  ;;  %v1134_v10 = vld [vmem:[%s1634_s1 + $0xa8] sm:$0xff] }
   0x4   :  { %v1144_v3 = vld [vmem:[%s1634_s1 + $0xf8] sm:$0xff]  ;;  %456 = vmatpush.bf16.msra.mxu2 %v1136_v2  ;;  %v1143_v7 = vld [vmem:[%s1634_s1 + $0xf0] sm:$0xff]  ;;  %v1142_v11 = vld [vmem:[%s1634_s1 + $0xe8] sm:$0xff] }
   0x5   :  { %470 = vmatpush.bf16.msra.mxu3 %v1144_v3  ;;  %v1117_v12 = vld [vmem:[%s1634_s1 + $0x20] sm:$0xff]  ;;  %v1116_v16 = vld [vmem:[%s1634_s1 + $0x18] sm:$0xff] }
   0x6   :  { %429 = vmatpush.bf16.msra.mxu0 %v1119_v4  ;;  %v1125_v13 = vld [vmem:[%s1634_s1 + $0x60] sm:$0xff]  ;;  %v1124_v17 = vld [vmem:[%s1634_s1 + $0x58] sm:$0xff] }
   0x7   :  { %443 = vmatpush.bf16.msra.mxu1 %v1127_v5  ;;  %v1133_v14 = vld [vmem:[%s1634_s1 + $0xa0] sm:$0xff]  ;;  %v1132_v18 = vld [vmem:[%s1634_s1 + $0x98] sm:$0xff] }
   0x8   :  { %457 = vmatpush.bf16.msra.mxu2 %v1135_v6  ;;  %v1141_v15 = vld [vmem:[%s1634_s1 + $0xe0] sm:$0xff]  ;;  %v1140_v19 = vld [vmem:[%s1634_s1 + $0xd8] sm:$0xff] }
   0x9   :  { %471 = vmatpush.bf16.msra.mxu3 %v1143_v7 }
   0xa   :  { %430 = vmatpush.bf16.msra.mxu0 %v1118_v8 }
   0xb   :  { %444 = vmatpush.bf16.msra.mxu1 %v1126_v9 }
   0xc   :  { %458 = vmatpush.bf16.msra.mxu2 %v1134_v10 }
   0xd   :  { %472 = vmatpush.bf16.msra.mxu3 %v1142_v11 }
   0xe   :  { %431 = vmatpush.bf16.msra.mxu0 %v1117_v12 }
   0xf   :  { %445 = vmatpush.bf16.msra.mxu1 %v1125_v13 }
  0x10   :  { %459 = vmatpush.bf16.msra.mxu2 %v1133_v14 }
  0x11   :  { %473 = vmatpush.bf16.msra.mxu3 %v1141_v15 }
  0x12   :  { %10 = vsyncpa [#allocation3], 0  ;;  %432 = vmatpush.bf16.msra.mxu0 %v1116_v16  ;;  %v1115_v20 = vld [vmem:[%s1634_s1 + $0x10] sm:$0xff]  ;;  %v1114_v24 = vld [vmem:[%s1634_s1 + $0x8] sm:$0xff]  ;;  %vm689_vm0 = vcmask 523264   ;;  %s807_s28 = sshll.u32 %s1638_s5, 4  ;;  %s808_s28 = int_to_ptr.hbm [resolvable:$true] %s807_s28 }
  0x13   :  { %446 = vmatpush.bf16.msra.mxu1 %v1124_v17  ;;  %v1123_v21 = vld [vmem:[%s1634_s1 + $0x50] sm:$0xff]  ;;  %v1122_v25 = vld [vmem:[%s1634_s1 + $0x48] sm:$0xff]  ;;  %v1113_v28 = vld [vmem:[%s1634_s1] sm:$0xff]  ;;  %s1220_s29 = smov 768   ;;  %s1221_s30 = smov 48  }
  0x14   :  { %460 = vmatpush.bf16.msra.mxu2 %v1132_v18  ;;  %v1131_v22 = vld [vmem:[%s1634_s1 + $0x90] sm:$0xff]  ;;  %v1130_v26 = vld [vmem:[%s1634_s1 + $0x88] sm:$0xff]  ;;  %v1121_v29 = vld [vmem:[%s1634_s1 + $0x40] sm:$0xff] }
  0x15   :  { %474 = vmatpush.bf16.msra.mxu3 %v1140_v19  ;;  %v1139_v23 = vld [vmem:[%s1634_s1 + $0xd0] sm:$0xff]  ;;  %v1138_v27 = vld [vmem:[%s1634_s1 + $0xc8] sm:$0xff]  ;;  %v1345_v30 = vld [vmem:[%s1633_s0] sm:$0xff] }
  0x16   :  { %433 = vmatpush.bf16.msra.mxu0 %v1115_v20  ;;  %v1350_v31 = vld [vmem:[%s1633_s0 + $0x30] sm:$0xff]  ;;  %v1355_v32 = vld [vmem:[%s1633_s0 + $0x8] sm:$0xff]  ;;  %v1360_v33 = vld [vmem:[%s1633_s0 + $0x38] sm:$0xff] }
  0x17   :  { %447 = vmatpush.bf16.msra.mxu1 %v1123_v21  ;;  %v1152_v34 = vld [vmem:[%s1634_s1 + $0x138] sm:$0xff]  ;;  %v1129_v36 = vld [vmem:[%s1634_s1 + $0x80] sm:$0xff]  ;;  %v1377_v38 = vld [vmem:[%s1633_s0 + $0x10] sm:$0xff]  ;;  %v34_v40 = vpack.c.bf16 %v1350_v31, %v1345_v30  ;;  %v35_v43 = vpack.c.bf16 %v1360_v33, %v1355_v32 }
  0x18   :  { %461 = vmatpush.bf16.msra.mxu2 %v1131_v22  ;;  %v1160_v35 = vld [vmem:[%s1634_s1 + $0x178] sm:$0xff]  ;;  %v1137_v37 = vld [vmem:[%s1634_s1 + $0xc0] sm:$0xff]  ;;  %v1394_v42 = vld [vmem:[%s1633_s0 + $0x48] sm:$0xff] }
  0x19   :  { %475 = vmatpush.bf16.msra.mxu3 %v1139_v23  ;;  %v1382_v39 = vld [vmem:[%s1633_s0 + $0x40] sm:$0xff]  ;;  %v1389_v41 = vld [vmem:[%s1633_s0 + $0x18] sm:$0xff]  ;;  %v1151_v44 = vld [vmem:[%s1634_s1 + $0x130] sm:$0xff] }
  0x1a   :  { %434 = vmatpush.bf16.msra.mxu0 %v1114_v24  ;;  %v1159_v45 = vld [vmem:[%s1634_s1 + $0x170] sm:$0xff]  ;;  %v36_v46 = vpack.c.bf16 %v1382_v39, %v1377_v38  ;;  %v37_v47 = vpack.c.bf16 %v1394_v42, %v1389_v41  ;;  %v1150_v48 = vld [vmem:[%s1634_s1 + $0x128] sm:$0xff]  ;;  %v1149_v50 = vld [vmem:[%s1634_s1 + $0x120] sm:$0xff] }
  0x1b   :  { %448 = vmatpush.bf16.msra.mxu1 %v1122_v25  ;;  %v1158_v49 = vld [vmem:[%s1634_s1 + $0x168] sm:$0xff]  ;;  %v1157_v51 = vld [vmem:[%s1634_s1 + $0x160] sm:$0xff]  ;;  %v1148_v52 = vld [vmem:[%s1634_s1 + $0x118] sm:$0xff] }
  0x1c   :  { %462 = vmatpush.bf16.msra.mxu2 %v1130_v26  ;;  %v1156_v53 = vld [vmem:[%s1634_s1 + $0x158] sm:$0xff]  ;;  %v1147_v54 = vld [vmem:[%s1634_s1 + $0x110] sm:$0xff]  ;;  %v1146_v56 = vld [vmem:[%s1634_s1 + $0x108] sm:$0xff] }
  0x1d   :  { %476 = vmatpush.bf16.msra.mxu3 %v1138_v27  ;;  %v1155_v55 = vld [vmem:[%s1634_s1 + $0x150] sm:$0xff]  ;;  %v1154_v57 = vld [vmem:[%s1634_s1 + $0x148] sm:$0xff]  ;;  %v1145_v58 = vld [vmem:[%s1634_s1 + $0x100] sm:$0xff] }
  0x1e   :  { %435 = vmatpush.bf16.msra.mxu0 %v1113_v28  ;;  %v1153_v59 = vld [vmem:[%s1634_s1 + $0x140] sm:$0xff]  ;;  %v1452_v61 = vld [vmem:[%s1633_s0 + $0x50] sm:$0xff]  ;;  %v1457_v62 = vld [vmem:[%s1633_s0 + $0x28] sm:$0xff] }
  0x1f   :  { %449 = vmatpush.bf16.msra.mxu1 %v1121_v29  ;;  %v1447_v60 = vld [vmem:[%s1633_s0 + $0x20] sm:$0xff]  ;;  %v1462_v63 = vld [vmem:[%s1633_s0 + $0x58] sm:$0xff]  ;;  %v1085_v5 = vld [vmem:[%s1636_s3 + $0x90] sm:$0xf] }
  0x20   :  { %463 = vmatpush.bf16.msra.mxu2 %v1129_v36  ;;  %v38_v0 = vpack.c.bf16 %v1452_v61, %v1447_v60  ;;  %v39_v1 = vpack.c.bf16 %v1462_v63, %v1457_v62  ;;  %v1188_v4 = vld [vmem:[%s1635_s2] ss:$0 sm:$0xff]  ;;  %v1182_v6 = vld [vmem:[%s1636_s3 + $0xa4] sm:$0xf0]  ;;  %v1179_v7 = vld [vmem:[%s1636_s3 + $0x94] sm:$0xf] }
  0x21   :  { %477 = vmatpush.bf16.msra.mxu3 %v1137_v37  ;;  %436 = vmatmul.bf16.vlgmr.msra.gmra.mxu0 %v34_v40  ;;  %v1086_v9 = vor.u32 %v1182_v6, %v1085_v5  ;;  %v1087_v10 = vld [vmem:[%s1636_s3 + $0xa8] sm:$0xf0]  ;;  %v1101_v11 = vld [vmem:[%s1636_s3 + $0xa0] sm:$0xf]  ;;  %v1184_v12 = vld [vmem:[%s1636_s3 + $0xb4] sm:$0xf0] }
  0x22   :  { %484 = vmatpush.bf16.msrb.mxu0 %v1152_v34  ;;  %450 = vmatmul.bf16.vlgmr.msra.gmra.mxu1 %v35_v43  ;;  %v1090_v13 = vor.u32 %v1179_v7, %v1087_v10  ;;  %v1102_v14 = vor.u32 %v1184_v12, %v1101_v11  ;;  %v1181_v15 = vld [vmem:[%s1636_s3 + $0xa4] sm:$0xf]  ;;  %v1103_v16 = vld [vmem:[%s1636_s3 + $0xb8] sm:$0xf0]  ;;  %v1061_v19 = vld [vmem:[%s1636_s3 + $0x60] sm:$0xf] }
  0x23   :  { %498 = vmatpush.bf16.msrb.mxu1 %v1160_v35  ;;  %464 = vmatmul.bf16.vlgmr.msra.gmra.mxu2 %v36_v46  ;;  %v1106_v18 = vor.u32 %v1181_v15, %v1103_v16  ;;  %v1176_v20 = vld [vmem:[%s1636_s3 + $0x74] sm:$0xf0]  ;;  %v1173_v21 = vld [vmem:[%s1636_s3 + $0x64] sm:$0xf]  ;;  %v1063_v24 = vld [vmem:[%s1636_s3 + $0x78] sm:$0xf0] }
  0x24   :  { %478 = vmatmul.bf16.vlgmr.msra.gmra.mxu3 %v37_v47  ;;  %697 = vmatpush.bf16.msrb.mxu2 %v1086_v9  ;;  %v1062_v23 = vor.u32 %v1176_v20, %v1061_v19  ;;  %v1077_v25 = vld [vmem:[%s1636_s3 + $0x70] sm:$0xf]  ;;  %v1178_v26 = vld [vmem:[%s1636_s3 + $0x84] sm:$0xf0]  ;;  %v1066_v29 = vor.u32 %v1173_v21, %v1063_v24  ;;  %v1175_v35 = vld [vmem:[%s1636_s3 + $0x74] sm:$0xf] }
  0x25   :  { %711 = vmatpush.bf16.msrb.mxu3 %v1090_v13  ;;  %v1078_v34 = vor.u32 %v1178_v26, %v1077_v25  ;;  %v1079_v36 = vld [vmem:[%s1636_s3 + $0x88] sm:$0xf0]  ;;  %v1037_v43 = vld [vmem:[%s1636_s3 + $0x30] sm:$0xf]  ;;  %v1166_v6 = vld [vmem:[%s1636_s3 + $0x24] sm:$0xf0] }
  0x26   :  { %485 = vmatpush.bf16.msrb.mxu0 %v1151_v44  ;;  %v1082_v37 = vor.u32 %v1175_v35, %v1079_v36  ;;  %v1170_v44 = vld [vmem:[%s1636_s3 + $0x44] sm:$0xf0]  ;;  %v1029_v5 = vld [vmem:[%s1636_s3 + $0x10] sm:$0xf]  ;;  %v1163_v11 = vld [vmem:[%s1636_s3 + $0x14] sm:$0xf] }
  0x27   :  { %499 = vmatpush.bf16.msrb.mxu1 %v1159_v45  ;;  %v1167_v45 = vld [vmem:[%s1636_s3 + $0x34] sm:$0xf]  ;;  %v1030_v10 = vor.u32 %v1166_v6, %v1029_v5  ;;  %v1031_v12 = vld [vmem:[%s1636_s3 + $0x28] sm:$0xf0]  ;;  %v1093_v15 = vld [vmem:[%s1636_s3 + $0x98] sm:$0xf] }
  0x28   :  { %698 = vmatpush.bf16.msrb.mxu2 %v1062_v23  ;;  %v1183_v16 = vld [vmem:[%s1636_s3 + $0xac] sm:$0xf0]  ;;  %v1180_v20 = vld [vmem:[%s1636_s3 + $0x9c] sm:$0xf]  ;;  %v1095_v21 = vld [vmem:[%s1636_s3 + $0xb0] sm:$0xf0] }
  0x29   :  { %712 = vmatpush.bf16.msrb.mxu3 %v1066_v29  ;;  %v1094_v19 = vor.u32 %v1183_v16, %v1093_v15  ;;  %v1098_v23 = vor.u32 %v1180_v20, %v1095_v21  ;;  %v1069_v25 = vld [vmem:[%s1636_s3 + $0x68] sm:$0xf]  ;;  %v1177_v26 = vld [vmem:[%s1636_s3 + $0x7c] sm:$0xf0] }
  0x2a   :  { %486 = vmatpush.bf16.msrb.mxu0 %v1150_v48  ;;  %v1038_v48 = vor.u32 %v1170_v44, %v1037_v43  ;;  %v1070_v35 = vor.u32 %v1177_v26, %v1069_v25  ;;  %v1168_v43 = vld [vmem:[%s1636_s3 + $0x3c] sm:$0xf] }
  0x2b   :  { %500 = vmatpush.bf16.msrb.mxu1 %v1158_v49  ;;  %v1039_v49 = vld [vmem:[%s1636_s3 + $0x48] sm:$0xf0] }
  0x2c   :  { %699 = vmatpush.bf16.msrb.mxu2 %v1038_v48 }
  0x2e   :  { %487 = vmatpush.bf16.msrb.mxu0 %v1149_v50  ;;  %v1053_v50 = vld [vmem:[%s1636_s3 + $0x40] sm:$0xf] }
  0x2f   :  { %501 = vmatpush.bf16.msrb.mxu1 %v1157_v51  ;;  %v1172_v51 = vld [vmem:[%s1636_s3 + $0x54] sm:$0xf0] }
  0x32   :  { %488 = vmatpush.bf16.msrb.mxu0 %v1148_v52  ;;  %v1042_v52 = vor.u32 %v1167_v45, %v1039_v49  ;;  %v1047_v45 = vld [vmem:[%s1636_s3 + $0x50] sm:$0xf0] }
  0x33   :  { %502 = vmatpush.bf16.msrb.mxu1 %v1156_v53  ;;  %v1054_v53 = vor.u32 %v1172_v51, %v1053_v50  ;;  %v1050_v50 = vor.u32 %v1168_v43, %v1047_v45  ;;  %v1021_v51 = vld [vmem:[%s1636_s3 + $0x8] sm:$0xf] }
  0x34   :  { %713 = vmatpush.bf16.msrb.mxu3 %v1042_v52  ;;  %v1165_v52 = vld [vmem:[%s1636_s3 + $0x1c] sm:$0xf0] }
  0x36   :  { %489 = vmatpush.bf16.msrb.mxu0 %v1147_v54  ;;  %v1169_v54 = vld [vmem:[%s1636_s3 + $0x44] sm:$0xf] }
  0x37   :  { %503 = vmatpush.bf16.msrb.mxu1 %v1155_v55  ;;  %v1055_v55 = vld [vmem:[%s1636_s3 + $0x58] sm:$0xf0] }
  0x3a   :  { %490 = vmatpush.bf16.msrb.mxu0 %v1146_v56  ;;  %v1058_v56 = vor.u32 %v1169_v54, %v1055_v55  ;;  %v1162_v55 = vld [vmem:[%s1636_s3 + $0xc] sm:$0xf] }
  0x3b   :  { %504 = vmatpush.bf16.msrb.mxu1 %v1154_v57  ;;  %v1013_v57 = vld [vmem:[%s1636_s3] sm:$0xf] }
  0x3e   :  { %491 = vmatpush.bf16.msrb.mxu0 %v1145_v58  ;;  %v1164_v58 = vld [vmem:[%s1636_s3 + $0x14] sm:$0xf0] }
  0x3f   :  { %505 = vmatpush.bf16.msrb.mxu1 %v1153_v59  ;;  %v1161_v59 = vld [vmem:[%s1636_s3 + $0x4] sm:$0xf] }
  0x41   :  { %492 = vmatmul.bf16.vlgmr.msrb.gmra.mxu0 %v38_v0 }
  0x42   :  { %506 = vmatmul.bf16.vlgmr.msrb.gmra.mxu1 %v39_v1  ;;  %753 = vmatpush.bf16.msra.mxu0 %v1102_v14  ;;  %v1034_v14 = vor.u32 %v1163_v11, %v1031_v12 }
  0x43   :  { %767 = vmatpush.bf16.msra.mxu1 %v1106_v18 }
  0x46   :  { %754 = vmatpush.bf16.msra.mxu0 %v1078_v34 }
  0x47   :  { %768 = vmatpush.bf16.msra.mxu1 %v1082_v37  ;;  %v1045_v37 = vld [vmem:[%s1636_s3 + $0x38] sm:$0xf] }
  0x4a   :  { %755 = vmatpush.bf16.msra.mxu0 %v1054_v53 }
  0x4b   :  { %769 = vmatpush.bf16.msra.mxu1 %v1058_v56  ;;  %v1023_v56 = vld [vmem:[%s1636_s3 + $0x20] sm:$0xf0] }
  0x4e   :  { %756 = vmatpush.bf16.msra.mxu0 %v1030_v10 }
  0x4f   :  { %770 = vmatpush.bf16.msra.mxu1 %v1034_v14  ;;  %v555_v14 = vld [vmem:[%s1637_s4] sm:$0x3f]  ;;  %s1219_s4 = smov [#allocation2]  }
  0x50   :  { %v561_v15 = vperm.slane %v555_v14, 4  ;;  %v562_v16 = vperm.slane %v555_v14, 5  ;;  %v557_v21 = vperm.slane %v555_v14, 0  ;;  %s805_s25 = sshll.u32 %s1219_s4, 4  ;;  %s806_s25 = int_to_ptr.vmem [resolvable:$true] %s805_s25 }
  0x9e   :  { %v437_v2 = vpop.f32.mrf.mxu0 }
  0x9f   :  { %v451_v3 = vpop.f32.mrf.mxu1  ;;  %v438_v8 = vadd.f32 %v1188_v4, %v437_v2 }
  0xa1   :  { %v452_v22 = vadd.f32 %v451_v3, %v438_v8  ;;  %v1014_v3 = vor.u32 %v1164_v58, %v1013_v57  ;;  %v1022_v58 = vor.u32 %v1165_v52, %v1021_v51 }
  0xa3   :  { %700 = vmatpush.bf16.msrb.mxu2 %v1014_v3 }
  0xa6   :  { %v465_v17 = vpop.f32.mrf.mxu2  ;;  %v439_v27 = vpop.f32.mrf.mxu0 }
  0xa7   :  { %v453_v28 = vpop.f32.mrf.mxu1  ;;  %v479_v40 = vpop.f32.mrf.mxu3  ;;  %v466_v46 = vadd.f32 %v465_v17, %v452_v22  ;;  %v440_v47 = vadd.f32 %v1188_v4, %v439_v27  ;;  %v1015_v4 = vld [vmem:[%s1636_s3 + $0x18] sm:$0xf0]  ;;  %725 = vmatpush.bf16.msra.mxu2 %v1094_v19  ;;  %v1174_v27 = vld [vmem:[%s1636_s3 + $0x6c] sm:$0xf] }
  0xa8   :  { %v1018_v9 = vor.u32 %v1161_v59, %v1015_v4  ;;  %v1026_v59 = vor.u32 %v1162_v55, %v1023_v56 }
  0xa9   :  { %v480_v0 = vadd.f32 %v479_v40, %v466_v46  ;;  %v454_v1 = vadd.f32 %v453_v28, %v440_v47  ;;  %v1071_v28 = vld [vmem:[%s1636_s3 + $0x80] sm:$0xf0]  ;;  %v1171_v40 = vld [vmem:[%s1636_s3 + $0x4c] sm:$0xf0] }
  0xaa   :  { %714 = vmatpush.bf16.msrb.mxu3 %v1018_v9  ;;  %v1074_v36 = vor.u32 %v1174_v27, %v1071_v28  ;;  %v1046_v48 = vor.u32 %v1171_v40, %v1045_v37 }
  0xab   :  { %726 = vmatpush.bf16.msra.mxu2 %v1070_v35 }
  0xae   :  { %v467_v2 = vpop.f32.mrf.mxu2  ;;  %739 = vmatpush.bf16.msra.mxu3 %v1098_v23 }
  0xaf   :  { %v468_v17 = vadd.f32 %v467_v2, %v454_v1  ;;  %v481_v22 = vpop.f32.mrf.mxu3  ;;  %727 = vmatpush.bf16.msra.mxu2 %v1046_v48  ;;  %v560_v48 = vperm.slane %v555_v14, 3 }
  0xb1   :  { %v482_v29 = vadd.f32 %v481_v22, %v468_v17  ;;  %v558_v22 = vperm.slane %v555_v14, 1 }
  0xb2   :  { %740 = vmatpush.bf16.msra.mxu3 %v1074_v36 }
  0xb3   :  { %728 = vmatpush.bf16.msra.mxu2 %v1022_v58 }
  0xb6   :  { %741 = vmatpush.bf16.msra.mxu3 %v1050_v50 }
  0xba   :  { %742 = vmatpush.bf16.msra.mxu3 %v1026_v59 }
  0xbe   :  { %v493_v7 = vpop.f32.mrf.mxu0 }
  0xbf   :  { %v507_v8 = vpop.f32.mrf.mxu1  ;;  %v494_v13 = vadd.f32 %v493_v7, %v480_v0 }
  0xc1   :  { %v508_v18 = vadd.f32 %v507_v8, %v494_v13 }
  0xc3   :  { %v514_v24 = vmul.f32 0.044715, %v508_v18  ;;  %v512_v8 = vmul.f32 0.5, %v508_v18 }
  0xc5   :  { %v516_v34 = vmul.f32 %v514_v24, %v508_v18 }
  0xc6   :  { %v495_v44 = vpop.f32.mrf.mxu0 }
  0xc7   :  { %v518_v46 = vmul.f32 %v516_v34, %v508_v18  ;;  %v496_v47 = vadd.f32 %v495_v44, %v482_v29  ;;  %v509_v49 = vpop.f32.mrf.mxu1 }
  0xc9   :  { %v520_v53 = vadd.f32 %v518_v46, %v508_v18  ;;  %v510_v54 = vadd.f32 %v509_v49, %v496_v47  ;;  %v559_v47 = vperm.slane %v555_v14, 2 }
  0xcb   :  { %v515_v57 = vmul.f32 0.044715, %v510_v54  ;;  %v522_v0 = vmul.f32 0.7978846, %v520_v53  ;;  %v513_v9 = vmul.f32 0.5, %v510_v54 }
  0xcd   :  { %v517_v1 = vmul.f32 %v515_v57, %v510_v54  ;;  %1189 = vtanh.f32 %v522_v0 }
  0xcf   :  { %v519_v2 = vmul.f32 %v517_v1, %v510_v54 }
  0xd1   :  { %v521_v3 = vadd.f32 %v519_v2, %v510_v54 }
  0xd3   :  { %v523_v4 = vmul.f32 0.7978846, %v521_v3  ;;  %v1190_v5 = vpop.eup %1189 }
  0xd4   :  { %v526_v6 = vadd.f32 1.0, %v1190_v5 }
  0xd5   :  { %1191 = vtanh.f32 %v523_v4 }
  0xd6   :  { %v528_v11 = vmul.f32 %v526_v6, %v512_v8 }
  0xdb   :  { %v1192_v7 = vpop.eup %1191 }
  0xdc   :  { %v527_v10 = vadd.f32 1.0, %v1192_v7 }
  0xde   :  { %v529_v12 = vmul.f32 %v527_v10, %v513_v9 }
  0xe0   :  { %v530_v13 = vpack.c.bf16 %v529_v12, %v528_v11 }
  0xe2   :  { %1107 = vmatmul.msk.bf16.vlgmr.msrb.gmra.mxu2 %vm689_vm0, %v530_v13  ;;  %1108 = vmatmul.msk.bf16.vlgmr.msrb.gmra.mxu3 %vm689_vm0, %v530_v13 }
  0xe3   :  { %1111 = vmatmul.msk.bf16.vlgmr.msra.gmra.mxu0 %vm689_vm0, %v530_v13  ;;  %1112 = vmatmul.msk.bf16.vlgmr.msra.gmra.mxu1 %vm689_vm0, %v530_v13 }
  0xf2   :  { %1109 = vmatmul.msk.bf16.vlgmr.msra.gmra.mxu2 %vm689_vm0, %v530_v13  ;;  %1110 = vmatmul.msk.bf16.vlgmr.msra.gmra.mxu3 %vm689_vm0, %v530_v13 }
 0x160   :  { %v758_v17 = vpop.f32.mrf.mxu0  ;;  %v772_v18 = vpop.f32.mrf.mxu1 }
 0x161   :  { %v759_v19 = vadd.f32 %v758_v17, %v561_v15  ;;  %v773_v20 = vadd.f32 %v772_v18, %v562_v16 }
 0x163   :  { %v781_v23 = vadd.f32 %v759_v19, %v1447_v60  ;;  %v782_v24 = vadd.f32 %v773_v20, %v1457_v62 }
 0x165   :  { %793 = vst [vmem:[#allocation2 + $0x20] sm:$0xff] %v781_v23  ;;  %v702_v25 = vpop.f32.mrf.mxu2  ;;  %v716_v26 = vpop.f32.mrf.mxu3 }
 0x166   :  { %794 = vst [vmem:[#allocation2 + $0x28] sm:$0xff] %v782_v24  ;;  %v703_v27 = vadd.f32 %v702_v25, %v557_v21  ;;  %v717_v28 = vadd.f32 %v716_v26, %v558_v22 }
 0x168   :  { %v777_v29 = vadd.f32 %v703_v27, %v1345_v30  ;;  %v778_v34 = vadd.f32 %v717_v28, %v1355_v32  ;;  %v760_v35 = vpop.f32.mrf.mxu0  ;;  %v774_v36 = vpop.f32.mrf.mxu1 }
 0x169   :  { %v761_v37 = vadd.f32 %v760_v35, %v561_v15  ;;  %v775_v40 = vadd.f32 %v774_v36, %v562_v16 }
 0x16a   :  { %789 = vst [vmem:[#allocation2] sm:$0xff] %v777_v29 }
 0x16b   :  { %790 = vst [vmem:[#allocation2 + $0x8] sm:$0xff] %v778_v34  ;;  %v787_v60 = vadd.f32 %v761_v37, %v1452_v61  ;;  %v788_v62 = vadd.f32 %v775_v40, %v1462_v63 }
 0x16d   :  { %799 = vst [vmem:[#allocation2 + $0x50] sm:$0xff] %v787_v60  ;;  %v704_v43 = vpop.f32.mrf.mxu2  ;;  %v718_v44 = vpop.f32.mrf.mxu3 }
 0x16e   :  { %800 = vst [vmem:[#allocation2 + $0x58] sm:$0xff] %v788_v62  ;;  %v705_v45 = vadd.f32 %v704_v43, %v557_v21  ;;  %v719_v46 = vadd.f32 %v718_v44, %v558_v22 }
 0x170   :  { %v783_v30 = vadd.f32 %v705_v45, %v1350_v31  ;;  %v784_v32 = vadd.f32 %v719_v46, %v1360_v33 }
 0x172   :  { %795 = vst [vmem:[#allocation2 + $0x30] sm:$0xff] %v783_v30 }
 0x173   :  { %796 = vst [vmem:[#allocation2 + $0x38] sm:$0xff] %v784_v32 }
 0x175   :  { %v730_v49 = vpop.f32.mrf.mxu2  ;;  %v744_v50 = vpop.f32.mrf.mxu3 }
 0x176   :  { %v731_v51 = vadd.f32 %v730_v49, %v559_v47  ;;  %v745_v61 = vadd.f32 %v744_v50, %v560_v48 }
 0x178   :  { %v779_v63 = vadd.f32 %v731_v51, %v1377_v38  ;;  %v780_v52 = vadd.f32 %v745_v61, %v1389_v41 }
 0x17a   :  { %791 = vst [vmem:[#allocation2 + $0x10] sm:$0xff] %v779_v63 }
 0x17b   :  { %792 = vst [vmem:[#allocation2 + $0x18] sm:$0xff] %v780_v52 }
 0x17d   :  { %v732_v53 = vpop.f32.mrf.mxu2  ;;  %v746_v54 = vpop.f32.mrf.mxu3 }
 0x17e   :  { %v733_v31 = vadd.f32 %v732_v53, %v559_v47  ;;  %v747_v33 = vadd.f32 %v746_v54, %v560_v48 }
 0x180   :  { %v785_v55 = vadd.f32 %v733_v31, %v1382_v39  ;;  %v786_v56 = vadd.f32 %v747_v33, %v1394_v42 }
 0x182   :  { %797 = vst [vmem:[#allocation2 + $0x40] sm:$0xff] %v785_v55 }
 0x183   :  { %798 = vst [vmem:[#allocation2 + $0x48] sm:$0xff] %v786_v56 }
 0x184   :  { %813 = dma.vmem_to_hbm [thread:$0]  %s806_s25, 1536, %s808_s28, [#allocation3], %s1220_s29, %s1220_s29, %s1221_s30  }
 0x185   :  { %1217 = dma.done.wait [#allocation3], 1536  }
 0x186   :  { %1218 = vsyncadd [#allocation3], 4294965760 }
 0x187   :  { %818 = vsyncpa [#allocation3], 1 }

</bundles_post_ra>
